<compile_context>
chip_gen: v7x
topology: tpu7x:2x2x1
jax: 0.10.0
libtpu: 0.0.40
codegen_flags: <defaults>
</compile_context>

<pallas_src>
import jax
import jax.numpy as jnp
from jax.experimental import pallas as pl
from jax.experimental.pallas import tpu as pltpu

# ---- static model config (small, consistent with the module) ----
EMB_SIZE    = 32          # == HID_SIZE (required by weight tying)
HID_SIZE    = 32
VOCAB_SIZE  = 64
LATENT_SIZE = 8
KERNEL_SIZE = 3
DILATIONS   = (1, 2, 4)

BATCH = 2
SEQ   = 16

VPAD = 128                                  # vocab padded to a full lane width
PAD  = (KERNEL_SIZE - 1) * max(DILATIONS)   # causal left-pad covering all layers (= 8)

SELU_ALPHA = 1.6732632423543772
SELU_SCALE = 1.0507009873554805

assert EMB_SIZE == HID_SIZE, "weight tying requires emb_size == hid_size"


def _selu(x):
    return SELU_SCALE * jnp.where(x > 0, x, SELU_ALPHA * (jnp.exp(x) - 1.0))


def cnn_decoder_kernel(sent_ref, emb_ref, wout_ref, bout_ref, w_ref, bias_ref,
                       out_ref, xp_ref):
    """Single-program fused decoder.

    sent_ref : (M, 1)   int32   token ids, M = B*S (batch-major row order)
    emb_ref  : (VPAD, E)        zero-padded embedding table
    wout_ref : (E, VPAD)        tied output projection (= padded emb table^T)
    bout_ref : (1, VPAD)        output bias (zero in padded columns)
    w_ref    : (NL, K*C, H)     per-layer conv weights, K taps concatenated
    bias_ref : (NL, M, H)       per-layer bias = z @ Wz_sum^T + b, broadcast to rows
    out_ref  : (M, VPAD)        selu(logits), lane-dense
    xp_ref   : (B, PAD+S, C)    VMEM scratch; rows [0, PAD) stay zero (causal pad)
    """
    M = sent_ref.shape[0]
    B, PS, C = xp_ref.shape
    S = PS - PAD
    VP = emb_ref.shape[0]

    # --- embedding lookup fused into the kernel as a one-hot matmul -----------
    ids = sent_ref[...]                                            # (M, 1)
    lanes = jax.lax.broadcasted_iota(jnp.int32, (M, VP), 1)
    onehot = (lanes == ids).astype(jnp.float32)                    # (M, VPAD)
    cur = jnp.dot(onehot, emb_ref[...],
                  preferred_element_type=jnp.float32)              # (M, E)

    # --- zero the causal left-pad region once (covers every dilation) ---------
    xp_ref[:, :PAD, :] = jnp.zeros((B, PAD, C), jnp.float32)

    # TODO(synk): nn.Dropout is treated as identity (eval mode).
    # NOTE: matmul operands kept f32 (bf16 cast would be fine on v6e/v7x but the
    # kernel is latency-bound, so the win is negligible; f32 keeps exactness).

    # --- dilated causal conv layers: one fused matmul per layer ---------------
    for l, d in enumerate(DILATIONS):
        shift = (KERNEL_SIZE - 1) * d
        base = PAD - shift
        # write current activations into the padded scratch (per batch element)
        for b in range(B):
            xp_ref[b, PAD:, :] = cur[b * S:(b + 1) * S, :]
        # im2col: tap k reads the window starting at base + k*d; concat taps on lanes
        taps = []
        for k in range(KERNEL_SIZE):
            o = base + k * d
            taps.append(jnp.concatenate(
                [xp_ref[b, o:o + S, :] for b in range(B)], axis=0))  # (M, C)
        x_i2c = jnp.concatenate(taps, axis=-1)                       # (M, K*C)
        acc = jnp.dot(x_i2c, w_ref[l],
                      preferred_element_type=jnp.float32) + bias_ref[l]
        cur = _selu(acc)                                             # (M, H)

    # --- tied-weight output projection, lane-dense (VPAD = 128) store ---------
    logits = jnp.dot(cur, wout_ref[...],
                     preferred_element_type=jnp.float32) + bout_ref[...]
    out_ref[...] = _selu(logits)


def prepare_params(params):
    """One-time weight preprocessing (hoisted out of the per-call forward)."""
    emb = params["emb_table"].astype(jnp.float32)                  # (V, E)
    V, E = emb.shape
    emb_pad = jnp.zeros((VPAD, E), jnp.float32).at[:V, :].set(emb)
    wout_pad = jnp.transpose(emb_pad)                              # (E, VPAD), tied
    bout_pad = jnp.zeros((1, VPAD), jnp.float32).at[0, :V].set(
        params["out_b"].astype(jnp.float32))

    wx_list, wz_list = [], []
    for i in range(len(DILATIONS)):
        w = params["conv_w"][i].astype(jnp.float32)                # (H, cin+L, K)
        cin = EMB_SIZE if i == 0 else HID_SIZE
        # x-part: per-tap (cin, H) blocks stacked along the contraction dim
        wx_list.append(jnp.concatenate(
            [jnp.transpose(w[:, :cin, k]) for k in range(KERNEL_SIZE)], axis=0))
        # z-part: z is present at every (padded and real) position -> per-batch
        # bias through the sum of taps.
        wz_list.append(jnp.transpose(jnp.sum(w[:, cin:, :], axis=2)))  # (L, H)

    return {
        "emb_pad": emb_pad,                                   # (VPAD, E)
        "wout_pad": wout_pad,                                 # (E, VPAD)
        "bout_pad": bout_pad,                                 # (1, VPAD)
        "wx": jnp.stack(wx_list, axis=0),                     # (NL, K*C, H)
        "wz": jnp.stack(wz_list, axis=0),                     # (NL, L, H)
        "conv_b": jnp.stack([b.astype(jnp.float32) for b in params["conv_b"]],
                            axis=0),                          # (NL, H)
    }


@jax.jit
def cnn_decoder_forward(prep, z, sentence):
    B, S = sentence.shape
    M = B * S
    NL, _, H = prep["wx"].shape

    # Latent-code contribution hoisted out of the kernel: per-layer (B, H) bias,
    # broadcast to every sequence position (batch-major rows = kernel row order).
    zbias = jnp.einsum("bl,nlh->nbh", z.astype(jnp.float32), prep["wz"])
    zbias = zbias + prep["conv_b"][:, None, :]                     # (NL, B, H)
    bias = jnp.broadcast_to(zbias[:, :, None, :], (NL, B, S, H)).reshape(NL, M, H)

    sent = sentence.reshape(M, 1).astype(jnp.int32)

    def full(shape):
        return pl.BlockSpec(shape, lambda i: (0,) * len(shape))

    out = pl.pallas_call(
        cnn_decoder_kernel,
        out_shape=jax.ShapeDtypeStruct((M, VPAD), jnp.float32),
        grid=(1,),                                  # single program: whole batch
        in_specs=[full(sent.shape),
                  full(prep["emb_pad"].shape),
                  full(prep["wout_pad"].shape),
                  full(prep["bout_pad"].shape),
                  full(prep["wx"].shape),
                  full(bias.shape)],
        out_specs=full((M, VPAD)),
        scratch_shapes=[pltpu.VMEM((B, PAD + S, HID_SIZE), jnp.float32)],
        compiler_params=pltpu.CompilerParams(
            dimension_semantics=("arbitrary",)),
    )(sent, prep["emb_pad"], prep["wout_pad"], prep["bout_pad"], prep["wx"], bias)

    return out.reshape(B, S, VPAD)[:, :, :VOCAB_SIZE]


def init_params(key):
    ks = jax.random.split(key, 8)
    emb_table = 0.1 * jax.random.normal(ks[0], (VOCAB_SIZE, EMB_SIZE), jnp.float32)
    conv_w, conv_b = [], []
    for i, _ in enumerate(DILATIONS):
        cin = (EMB_SIZE if i == 0 else HID_SIZE) + LATENT_SIZE
        conv_w.append(0.1 * jax.random.normal(
            ks[1 + i], (HID_SIZE, cin, KERNEL_SIZE), jnp.float32))   # torch (H, Cin, K)
        conv_b.append(0.01 * jax.random.normal(ks[4 + i], (HID_SIZE,), jnp.float32))
    out_b = 0.01 * jax.random.normal(ks[7], (VOCAB_SIZE,), jnp.float32)
    return {"emb_table": emb_table, "conv_w": conv_w, "conv_b": conv_b, "out_b": out_b}


def reference_forward(params, z, sentence):
    """Pure-JAX reference mirroring the PyTorch forward exactly."""
    emb_table = params["emb_table"]
    out = jnp.take(emb_table, sentence, axis=0)          # (B, S, E)
    B = out.shape[0]
    for i, d in enumerate(DILATIONS):
        shift = (KERNEL_SIZE - 1) * d
        out = jnp.concatenate(
            [jnp.zeros((B, shift, out.shape[-1]), out.dtype), out], axis=1)
        zrep = jnp.broadcast_to(z[:, None, :], (B, out.shape[1], z.shape[-1]))
        out = jnp.concatenate([out, zrep], axis=-1)
        x_ncw = jnp.transpose(out, (0, 2, 1))
        y = jax.lax.conv_general_dilated(
            x_ncw, params["conv_w"][i], window_strides=(1,), padding="VALID",
            rhs_dilation=(d,), dimension_numbers=("NCH", "OIH", "NCH"))
        y = y + params["conv_b"][i][None, :, None]
        out = jax.nn.selu(jnp.transpose(y, (0, 2, 1)))
    logits = out @ emb_table.T + params["out_b"]
    return jax.nn.selu(logits)


if __name__ == "__main__":
    key = jax.random.PRNGKey(0)
    pkey, zkey, skey = jax.random.split(key, 3)
    params = init_params(pkey)
    prep = prepare_params(params)        # one-time weight prep (out of forward path)

    z = 0.5 * jax.random.normal(zkey, (BATCH, LATENT_SIZE), jnp.float32)
    sentence = jax.random.randint(skey, (BATCH, SEQ), 0, VOCAB_SIZE, dtype=jnp.int32)

    out = cnn_decoder_forward(prep, z, sentence)
    out = jax.block_until_ready(out)

    ref = reference_forward(params, z, sentence)
    assert out.shape == (BATCH, SEQ, VOCAB_SIZE), out.shape
    assert bool(jnp.all(jnp.isfinite(out)))
    max_err = float(jnp.max(jnp.abs(out - ref)))
    assert max_err < 5e-2, f"mismatch vs reference: max abs err = {max_err}"
    print("KERNEL_OK")
</pallas_src>

<mosaic_0001>
module attributes {stable_mosaic.version = 11 : i64} {
  func.func @cnn_decoder_kernel(%arg0: i32, %arg1: memref<32x1xi32, #tpu.memory_space<vmem>>, %arg2: memref<128x32xf32, #tpu.memory_space<vmem>>, %arg3: memref<32x128xf32, #tpu.memory_space<vmem>>, %arg4: memref<1x128xf32, #tpu.memory_space<vmem>>, %arg5: memref<3x96x32xf32, #tpu.memory_space<vmem>>, %arg6: memref<3x32x32xf32, #tpu.memory_space<vmem>>, %arg7: memref<32x128xf32, #tpu.memory_space<vmem>>, %arg8: memref<2x24x32xf32, #tpu.memory_space<vmem>>) attributes {dimension_semantics = [#tpu.dimension_semantics<arbitrary>], iteration_bounds = array<i64: 1>, scalar_prefetch = 0 : i64, scratch_operands = 1 : i64, tpu.core_type = #tpu.core_type<tc>, window_params = [{pipeline_mode = #tpu.pipeline_mode<synchronous>, transform_indices = @transform_0, window_bounds = array<i64: 32, 1>}, {pipeline_mode = #tpu.pipeline_mode<synchronous>, transform_indices = @transform_1, window_bounds = array<i64: 128, 32>}, {pipeline_mode = #tpu.pipeline_mode<synchronous>, transform_indices = @transform_2, window_bounds = array<i64: 32, 128>}, {pipeline_mode = #tpu.pipeline_mode<synchronous>, transform_indices = @transform_3, window_bounds = array<i64: 1, 128>}, {pipeline_mode = #tpu.pipeline_mode<synchronous>, transform_indices = @transform_4, window_bounds = array<i64: 3, 96, 32>}, {pipeline_mode = #tpu.pipeline_mode<synchronous>, transform_indices = @transform_5, window_bounds = array<i64: 3, 32, 32>}, {pipeline_mode = #tpu.pipeline_mode<synchronous>, transform_indices = @transform_6, window_bounds = array<i64: 32, 128>}]} {
    %c0 = arith.constant 0 : index
    %c0_0 = arith.constant 0 : index
    %0 = vector.load %arg1[%c0, %c0_0] : memref<32x1xi32, #tpu.memory_space<vmem>>, vector<32x1xi32>
    %1 = tpu.iota {dimensions = array<i32: 1>} : vector<32x128xi32>
    %2 = vector.broadcast %0 : vector<32x1xi32> to vector<32x128xi32>
    %3 = arith.cmpi eq, %1, %2 : vector<32x128xi32>
    %4 = arith.extui %3 : vector<32x128xi1> to vector<32x128xi32>
    %5 = arith.sitofp %4 : vector<32x128xi32> to vector<32x128xf32>
    %c0_1 = arith.constant 0 : index
    %c0_2 = arith.constant 0 : index
    %6 = vector.load %arg2[%c0_1, %c0_2] : memref<128x32xf32, #tpu.memory_space<vmem>>, vector<128x32xf32>
    %cst = arith.constant dense<0.000000e+00> : vector<32x32xf32>
    %7 = tpu.matmul %5, %6, %cst {dimension_numbers = #tpu.dot_dimension_numbers<[1], [0], [0], [1], [0, 0, 1, 1], [], []>} : vector<32x128xf32>, vector<128x32xf32>, vector<32x32xf32> -> vector<32x32xf32>
    %cst_3 = arith.constant 0.000000e+00 : f32
    %8 = vector.broadcast %cst_3 : f32 to vector<2x8x32xf32>
    %c0_4 = arith.constant 0 : index
    %c0_5 = arith.constant 0 : index
    %c0_6 = arith.constant 0 : index
    %9 = vector.load %arg8[%c0_4, %c0_5, %c0_6] : memref<2x24x32xf32, #tpu.memory_space<vmem>>, vector<2x8x32xf32>
    tpu.vector_store %arg8[%c0_4, %c0_5, %c0_6], %8 {strides = array<i32>} : memref<2x24x32xf32, #tpu.memory_space<vmem>>, vector<2x8x32xf32>,
    %10 = vector.extract_strided_slice %7 {offsets = [0, 0], sizes = [16, 32], strides = [1, 1]} : vector<32x32xf32> to vector<16x32xf32>
    %c0_7 = arith.constant 0 : index
    %c8 = arith.constant 8 : index
    %c0_8 = arith.constant 0 : index
    %11 = vector.load %arg8[%c0_7, %c8, %c0_8] : memref<2x24x32xf32, #tpu.memory_space<vmem>>, vector<1x16x32xf32>
    %12 = vector.shape_cast %11 : vector<1x16x32xf32> to vector<16x32xf32>
    %13 = vector.shape_cast %10 : vector<16x32xf32> to vector<1x16x32xf32>
    tpu.vector_store %arg8[%c0_7, %c8, %c0_8], %13 {strides = array<i32>} : memref<2x24x32xf32, #tpu.memory_space<vmem>>, vector<1x16x32xf32>,
    %14 = vector.extract_strided_slice %7 {offsets = [16, 0], sizes = [16, 32], strides = [1, 1]} : vector<32x32xf32> to vector<16x32xf32>
    %c1 = arith.constant 1 : index
    %c8_9 = arith.constant 8 : index
    %c0_10 = arith.constant 0 : index
    %15 = vector.load %arg8[%c1, %c8_9, %c0_10] : memref<2x24x32xf32, #tpu.memory_space<vmem>>, vector<1x16x32xf32>
    %16 = vector.shape_cast %15 : vector<1x16x32xf32> to vector<16x32xf32>
    %17 = vector.shape_cast %14 : vector<16x32xf32> to vector<1x16x32xf32>
    tpu.vector_store %arg8[%c1, %c8_9, %c0_10], %17 {strides = array<i32>} : memref<2x24x32xf32, #tpu.memory_space<vmem>>, vector<1x16x32xf32>,
    %c0_11 = arith.constant 0 : index
    %c6 = arith.constant 6 : index
    %c0_12 = arith.constant 0 : index
    %18 = vector.load %arg8[%c0_11, %c6, %c0_12] : memref<2x24x32xf32, #tpu.memory_space<vmem>>, vector<1x16x32xf32>
    %19 = vector.shape_cast %18 : vector<1x16x32xf32> to vector<16x32xf32>
    %c1_13 = arith.constant 1 : index
    %c6_14 = arith.constant 6 : index
    %c0_15 = arith.constant 0 : index
    %20 = vector.load %arg8[%c1_13, %c6_14, %c0_15] : memref<2x24x32xf32, #tpu.memory_space<vmem>>, vector<1x16x32xf32>
    %21 = vector.shape_cast %20 : vector<1x16x32xf32> to vector<16x32xf32>
    %22 = tpu.concatenate %19, %21 in 0 : vector<16x32xf32>, vector<16x32xf32> -> vector<32x32xf32>
    %c0_16 = arith.constant 0 : index
    %c7 = arith.constant 7 : index
    %c0_17 = arith.constant 0 : index
    %23 = vector.load %arg8[%c0_16, %c7, %c0_17] : memref<2x24x32xf32, #tpu.memory_space<vmem>>, vector<1x16x32xf32>
    %24 = vector.shape_cast %23 : vector<1x16x32xf32> to vector<16x32xf32>
    %c1_18 = arith.constant 1 : index
    %c7_19 = arith.constant 7 : index
    %c0_20 = arith.constant 0 : index
    %25 = vector.load %arg8[%c1_18, %c7_19, %c0_20] : memref<2x24x32xf32, #tpu.memory_space<vmem>>, vector<1x16x32xf32>
    %26 = vector.shape_cast %25 : vector<1x16x32xf32> to vector<16x32xf32>
    %27 = tpu.concatenate %24, %26 in 0 : vector<16x32xf32>, vector<16x32xf32> -> vector<32x32xf32>
    %c0_21 = arith.constant 0 : index
    %c8_22 = arith.constant 8 : index
    %c0_23 = arith.constant 0 : index
    %28 = vector.load %arg8[%c0_21, %c8_22, %c0_23] : memref<2x24x32xf32, #tpu.memory_space<vmem>>, vector<1x16x32xf32>
    %29 = vector.shape_cast %28 : vector<1x16x32xf32> to vector<16x32xf32>
    %c1_24 = arith.constant 1 : index
    %c8_25 = arith.constant 8 : index
    %c0_26 = arith.constant 0 : index
    %30 = vector.load %arg8[%c1_24, %c8_25, %c0_26] : memref<2x24x32xf32, #tpu.memory_space<vmem>>, vector<1x16x32xf32>
    %31 = vector.shape_cast %30 : vector<1x16x32xf32> to vector<16x32xf32>
    %32 = tpu.concatenate %29, %31 in 0 : vector<16x32xf32>, vector<16x32xf32> -> vector<32x32xf32>
    %33 = tpu.concatenate %22, %27, %32 in 1 : vector<32x32xf32>, vector<32x32xf32>, vector<32x32xf32> -> vector<32x96xf32>
    %c0_27 = arith.constant 0 : index
    %c0_28 = arith.constant 0 : index
    %c0_29 = arith.constant 0 : index
    %34 = vector.load %arg5[%c0_27, %c0_28, %c0_29] : memref<3x96x32xf32, #tpu.memory_space<vmem>>, vector<1x96x32xf32>
    %35 = vector.shape_cast %34 : vector<1x96x32xf32> to vector<96x32xf32>
    %cst_30 = arith.constant dense<0.000000e+00> : vector<32x32xf32>
    %36 = tpu.matmul %33, %35, %cst_30 {dimension_numbers = #tpu.dot_dimension_numbers<[1], [0], [0], [1], [0, 0, 1, 1], [], []>} : vector<32x96xf32>, vector<96x32xf32>, vector<32x32xf32> -> vector<32x32xf32>
    %c0_31 = arith.constant 0 : index
    %c0_32 = arith.constant 0 : index
    %c0_33 = arith.constant 0 : index
    %37 = vector.load %arg6[%c0_31, %c0_32, %c0_33] : memref<3x32x32xf32, #tpu.memory_space<vmem>>, vector<1x32x32xf32>
    %38 = vector.shape_cast %37 : vector<1x32x32xf32> to vector<32x32xf32>
    %39 = arith.addf %36, %38 : vector<32x32xf32>
    %cst_34 = arith.constant 0.000000e+00 : f32
    %40 = vector.broadcast %cst_34 : f32 to vector<32x32xf32>
    %41 = arith.cmpf ogt, %39, %40 : vector<32x32xf32>
    %42 = math.exp %39 : vector<32x32xf32>
    %cst_35 = arith.constant 1.000000e+00 : f32
    %43 = vector.broadcast %cst_35 : f32 to vector<32x32xf32>
    %44 = arith.subf %42, %43 : vector<32x32xf32>
    %cst_36 = arith.constant 1.67326319 : f32
    %45 = vector.broadcast %cst_36 : f32 to vector<32x32xf32>
    %46 = arith.mulf %45, %44 : vector<32x32xf32>
    %47 = arith.select %41, %39, %46 : vector<32x32xi1>, vector<32x32xf32>
    %cst_37 = arith.constant 1.05070102 : f32
    %48 = vector.broadcast %cst_37 : f32 to vector<32x32xf32>
    %49 = arith.mulf %48, %47 : vector<32x32xf32>
    %50 = vector.extract_strided_slice %49 {offsets = [0, 0], sizes = [16, 32], strides = [1, 1]} : vector<32x32xf32> to vector<16x32xf32>
    %c0_38 = arith.constant 0 : index
    %c8_39 = arith.constant 8 : index
    %c0_40 = arith.constant 0 : index
    %51 = vector.load %arg8[%c0_38, %c8_39, %c0_40] : memref<2x24x32xf32, #tpu.memory_space<vmem>>, vector<1x16x32xf32>
    %52 = vector.shape_cast %51 : vector<1x16x32xf32> to vector<16x32xf32>
    %53 = vector.shape_cast %50 : vector<16x32xf32> to vector<1x16x32xf32>
    tpu.vector_store %arg8[%c0_38, %c8_39, %c0_40], %53 {strides = array<i32>} : memref<2x24x32xf32, #tpu.memory_space<vmem>>, vector<1x16x32xf32>,
    %54 = vector.extract_strided_slice %49 {offsets = [16, 0], sizes = [16, 32], strides = [1, 1]} : vector<32x32xf32> to vector<16x32xf32>
    %c1_41 = arith.constant 1 : index
    %c8_42 = arith.constant 8 : index
    %c0_43 = arith.constant 0 : index
    %55 = vector.load %arg8[%c1_41, %c8_42, %c0_43] : memref<2x24x32xf32, #tpu.memory_space<vmem>>, vector<1x16x32xf32>
    %56 = vector.shape_cast %55 : vector<1x16x32xf32> to vector<16x32xf32>
    %57 = vector.shape_cast %54 : vector<16x32xf32> to vector<1x16x32xf32>
    tpu.vector_store %arg8[%c1_41, %c8_42, %c0_43], %57 {strides = array<i32>} : memref<2x24x32xf32, #tpu.memory_space<vmem>>, vector<1x16x32xf32>,
    %c0_44 = arith.constant 0 : index
    %c4 = arith.constant 4 : index
    %c0_45 = arith.constant 0 : index
    %58 = vector.load %arg8[%c0_44, %c4, %c0_45] : memref<2x24x32xf32, #tpu.memory_space<vmem>>, vector<1x16x32xf32>
    %59 = vector.shape_cast %58 : vector<1x16x32xf32> to vector<16x32xf32>
    %c1_46 = arith.constant 1 : index
    %c4_47 = arith.constant 4 : index
    %c0_48 = arith.constant 0 : index
    %60 = vector.load %arg8[%c1_46, %c4_47, %c0_48] : memref<2x24x32xf32, #tpu.memory_space<vmem>>, vector<1x16x32xf32>
    %61 = vector.shape_cast %60 : vector<1x16x32xf32> to vector<16x32xf32>
    %62 = tpu.concatenate %59, %61 in 0 : vector<16x32xf32>, vector<16x32xf32> -> vector<32x32xf32>
    %c0_49 = arith.constant 0 : index
    %c6_50 = arith.constant 6 : index
    %c0_51 = arith.constant 0 : index
    %63 = vector.load %arg8[%c0_49, %c6_50, %c0_51] : memref<2x24x32xf32, #tpu.memory_space<vmem>>, vector<1x16x32xf32>
    %64 = vector.shape_cast %63 : vector<1x16x32xf32> to vector<16x32xf32>
    %c1_52 = arith.constant 1 : index
    %c6_53 = arith.constant 6 : index
    %c0_54 = arith.constant 0 : index
    %65 = vector.load %arg8[%c1_52, %c6_53, %c0_54] : memref<2x24x32xf32, #tpu.memory_space<vmem>>, vector<1x16x32xf32>
    %66 = vector.shape_cast %65 : vector<1x16x32xf32> to vector<16x32xf32>
    %67 = tpu.concatenate %64, %66 in 0 : vector<16x32xf32>, vector<16x32xf32> -> vector<32x32xf32>
    %c0_55 = arith.constant 0 : index
    %c8_56 = arith.constant 8 : index
    %c0_57 = arith.constant 0 : index
    %68 = vector.load %arg8[%c0_55, %c8_56, %c0_57] : memref<2x24x32xf32, #tpu.memory_space<vmem>>, vector<1x16x32xf32>
    %69 = vector.shape_cast %68 : vector<1x16x32xf32> to vector<16x32xf32>
    %c1_58 = arith.constant 1 : index
    %c8_59 = arith.constant 8 : index
    %c0_60 = arith.constant 0 : index
    %70 = vector.load %arg8[%c1_58, %c8_59, %c0_60] : memref<2x24x32xf32, #tpu.memory_space<vmem>>, vector<1x16x32xf32>
    %71 = vector.shape_cast %70 : vector<1x16x32xf32> to vector<16x32xf32>
    %72 = tpu.concatenate %69, %71 in 0 : vector<16x32xf32>, vector<16x32xf32> -> vector<32x32xf32>
    %73 = tpu.concatenate %62, %67, %72 in 1 : vector<32x32xf32>, vector<32x32xf32>, vector<32x32xf32> -> vector<32x96xf32>
    %c1_61 = arith.constant 1 : index
    %c0_62 = arith.constant 0 : index
    %c0_63 = arith.constant 0 : index
    %74 = vector.load %arg5[%c1_61, %c0_62, %c0_63] : memref<3x96x32xf32, #tpu.memory_space<vmem>>, vector<1x96x32xf32>
    %75 = vector.shape_cast %74 : vector<1x96x32xf32> to vector<96x32xf32>
    %cst_64 = arith.constant dense<0.000000e+00> : vector<32x32xf32>
    %76 = tpu.matmul %73, %75, %cst_64 {dimension_numbers = #tpu.dot_dimension_numbers<[1], [0], [0], [1], [0, 0, 1, 1], [], []>} : vector<32x96xf32>, vector<96x32xf32>, vector<32x32xf32> -> vector<32x32xf32>
    %c1_65 = arith.constant 1 : index
    %c0_66 = arith.constant 0 : index
    %c0_67 = arith.constant 0 : index
    %77 = vector.load %arg6[%c1_65, %c0_66, %c0_67] : memref<3x32x32xf32, #tpu.memory_space<vmem>>, vector<1x32x32xf32>
    %78 = vector.shape_cast %77 : vector<1x32x32xf32> to vector<32x32xf32>
    %79 = arith.addf %76, %78 : vector<32x32xf32>
    %cst_68 = arith.constant 0.000000e+00 : f32
    %80 = vector.broadcast %cst_68 : f32 to vector<32x32xf32>
    %81 = arith.cmpf ogt, %79, %80 : vector<32x32xf32>
    %82 = math.exp %79 : vector<32x32xf32>
    %cst_69 = arith.constant 1.000000e+00 : f32
    %83 = vector.broadcast %cst_69 : f32 to vector<32x32xf32>
    %84 = arith.subf %82, %83 : vector<32x32xf32>
    %cst_70 = arith.constant 1.67326319 : f32
    %85 = vector.broadcast %cst_70 : f32 to vector<32x32xf32>
    %86 = arith.mulf %85, %84 : vector<32x32xf32>
    %87 = arith.select %81, %79, %86 : vector<32x32xi1>, vector<32x32xf32>
    %cst_71 = arith.constant 1.05070102 : f32
    %88 = vector.broadcast %cst_71 : f32 to vector<32x32xf32>
    %89 = arith.mulf %88, %87 : vector<32x32xf32>
    %90 = vector.extract_strided_slice %89 {offsets = [0, 0], sizes = [16, 32], strides = [1, 1]} : vector<32x32xf32> to vector<16x32xf32>
    %c0_72 = arith.constant 0 : index
    %c8_73 = arith.constant 8 : index
    %c0_74 = arith.constant 0 : index
    %91 = vector.load %arg8[%c0_72, %c8_73, %c0_74] : memref<2x24x32xf32, #tpu.memory_space<vmem>>, vector<1x16x32xf32>
    %92 = vector.shape_cast %91 : vector<1x16x32xf32> to vector<16x32xf32>
    %93 = vector.shape_cast %90 : vector<16x32xf32> to vector<1x16x32xf32>
    tpu.vector_store %arg8[%c0_72, %c8_73, %c0_74], %93 {strides = array<i32>} : memref<2x24x32xf32, #tpu.memory_space<vmem>>, vector<1x16x32xf32>,
    %94 = vector.extract_strided_slice %89 {offsets = [16, 0], sizes = [16, 32], strides = [1, 1]} : vector<32x32xf32> to vector<16x32xf32>
    %c1_75 = arith.constant 1 : index
    %c8_76 = arith.constant 8 : index
    %c0_77 = arith.constant 0 : index
    %95 = vector.load %arg8[%c1_75, %c8_76, %c0_77] : memref<2x24x32xf32, #tpu.memory_space<vmem>>, vector<1x16x32xf32>
    %96 = vector.shape_cast %95 : vector<1x16x32xf32> to vector<16x32xf32>
    %97 = vector.shape_cast %94 : vector<16x32xf32> to vector<1x16x32xf32>
    tpu.vector_store %arg8[%c1_75, %c8_76, %c0_77], %97 {strides = array<i32>} : memref<2x24x32xf32, #tpu.memory_space<vmem>>, vector<1x16x32xf32>,
    %c0_78 = arith.constant 0 : index
    %c0_79 = arith.constant 0 : index
    %c0_80 = arith.constant 0 : index
    %98 = vector.load %arg8[%c0_78, %c0_79, %c0_80] : memref<2x24x32xf32, #tpu.memory_space<vmem>>, vector<1x16x32xf32>
    %99 = vector.shape_cast %98 : vector<1x16x32xf32> to vector<16x32xf32>
    %c1_81 = arith.constant 1 : index
    %c0_82 = arith.constant 0 : index
    %c0_83 = arith.constant 0 : index
    %100 = vector.load %arg8[%c1_81, %c0_82, %c0_83] : memref<2x24x32xf32, #tpu.memory_space<vmem>>, vector<1x16x32xf32>
    %101 = vector.shape_cast %100 : vector<1x16x32xf32> to vector<16x32xf32>
    %102 = tpu.concatenate %99, %101 in 0 : vector<16x32xf32>, vector<16x32xf32> -> vector<32x32xf32>
    %c0_84 = arith.constant 0 : index
    %c4_85 = arith.constant 4 : index
    %c0_86 = arith.constant 0 : index
    %103 = vector.load %arg8[%c0_84, %c4_85, %c0_86] : memref<2x24x32xf32, #tpu.memory_space<vmem>>, vector<1x16x32xf32>
    %104 = vector.shape_cast %103 : vector<1x16x32xf32> to vector<16x32xf32>
    %c1_87 = arith.constant 1 : index
    %c4_88 = arith.constant 4 : index
    %c0_89 = arith.constant 0 : index
    %105 = vector.load %arg8[%c1_87, %c4_88, %c0_89] : memref<2x24x32xf32, #tpu.memory_space<vmem>>, vector<1x16x32xf32>
    %106 = vector.shape_cast %105 : vector<1x16x32xf32> to vector<16x32xf32>
    %107 = tpu.concatenate %104, %106 in 0 : vector<16x32xf32>, vector<16x32xf32> -> vector<32x32xf32>
    %c0_90 = arith.constant 0 : index
    %c8_91 = arith.constant 8 : index
    %c0_92 = arith.constant 0 : index
    %108 = vector.load %arg8[%c0_90, %c8_91, %c0_92] : memref<2x24x32xf32, #tpu.memory_space<vmem>>, vector<1x16x32xf32>
    %109 = vector.shape_cast %108 : vector<1x16x32xf32> to vector<16x32xf32>
    %c1_93 = arith.constant 1 : index
    %c8_94 = arith.constant 8 : index
    %c0_95 = arith.constant 0 : index
    %110 = vector.load %arg8[%c1_93, %c8_94, %c0_95] : memref<2x24x32xf32, #tpu.memory_space<vmem>>, vector<1x16x32xf32>
    %111 = vector.shape_cast %110 : vector<1x16x32xf32> to vector<16x32xf32>
    %112 = tpu.concatenate %109, %111 in 0 : vector<16x32xf32>, vector<16x32xf32> -> vector<32x32xf32>
    %113 = tpu.concatenate %102, %107, %112 in 1 : vector<32x32xf32>, vector<32x32xf32>, vector<32x32xf32> -> vector<32x96xf32>
    %c2 = arith.constant 2 : index
    %c0_96 = arith.constant 0 : index
    %c0_97 = arith.constant 0 : index
    %114 = vector.load %arg5[%c2, %c0_96, %c0_97] : memref<3x96x32xf32, #tpu.memory_space<vmem>>, vector<1x96x32xf32>
    %115 = vector.shape_cast %114 : vector<1x96x32xf32> to vector<96x32xf32>
    %cst_98 = arith.constant dense<0.000000e+00> : vector<32x32xf32>
    %116 = tpu.matmul %113, %115, %cst_98 {dimension_numbers = #tpu.dot_dimension_numbers<[1], [0], [0], [1], [0, 0, 1, 1], [], []>} : vector<32x96xf32>, vector<96x32xf32>, vector<32x32xf32> -> vector<32x32xf32>
    %c2_99 = arith.constant 2 : index
    %c0_100 = arith.constant 0 : index
    %c0_101 = arith.constant 0 : index
    %117 = vector.load %arg6[%c2_99, %c0_100, %c0_101] : memref<3x32x32xf32, #tpu.memory_space<vmem>>, vector<1x32x32xf32>
    %118 = vector.shape_cast %117 : vector<1x32x32xf32> to vector<32x32xf32>
    %119 = arith.addf %116, %118 : vector<32x32xf32>
    %cst_102 = arith.constant 0.000000e+00 : f32
    %120 = vector.broadcast %cst_102 : f32 to vector<32x32xf32>
    %121 = arith.cmpf ogt, %119, %120 : vector<32x32xf32>
    %122 = math.exp %119 : vector<32x32xf32>
    %cst_103 = arith.constant 1.000000e+00 : f32
    %123 = vector.broadcast %cst_103 : f32 to vector<32x32xf32>
    %124 = arith.subf %122, %123 : vector<32x32xf32>
    %cst_104 = arith.constant 1.67326319 : f32
    %125 = vector.broadcast %cst_104 : f32 to vector<32x32xf32>
    %126 = arith.mulf %125, %124 : vector<32x32xf32>
    %127 = arith.select %121, %119, %126 : vector<32x32xi1>, vector<32x32xf32>
    %cst_105 = arith.constant 1.05070102 : f32
    %128 = vector.broadcast %cst_105 : f32 to vector<32x32xf32>
    %129 = arith.mulf %128, %127 : vector<32x32xf32>
    %c0_106 = arith.constant 0 : index
    %c0_107 = arith.constant 0 : index
    %130 = vector.load %arg3[%c0_106, %c0_107] : memref<32x128xf32, #tpu.memory_space<vmem>>, vector<32x128xf32>
    %cst_108 = arith.constant dense<0.000000e+00> : vector<32x128xf32>
    %131 = tpu.matmul %129, %130, %cst_108 {dimension_numbers = #tpu.dot_dimension_numbers<[1], [0], [0], [1], [0, 0, 1, 1], [], []>} : vector<32x32xf32>, vector<32x128xf32>, vector<32x128xf32> -> vector<32x128xf32>
    %c0_109 = arith.constant 0 : index
    %c0_110 = arith.constant 0 : index
    %132 = vector.load %arg4[%c0_109, %c0_110] : memref<1x128xf32, #tpu.memory_space<vmem>>, vector<1x128xf32>
    %133 = vector.broadcast %132 : vector<1x128xf32> to vector<32x128xf32>
    %134 = arith.addf %131, %133 : vector<32x128xf32>
    %cst_111 = arith.constant 0.000000e+00 : f32
    %135 = vector.broadcast %cst_111 : f32 to vector<32x128xf32>
    %136 = arith.cmpf ogt, %134, %135 : vector<32x128xf32>
    %137 = math.exp %134 : vector<32x128xf32>
    %cst_112 = arith.constant 1.000000e+00 : f32
    %138 = vector.broadcast %cst_112 : f32 to vector<32x128xf32>
    %139 = arith.subf %137, %138 : vector<32x128xf32>
    %cst_113 = arith.constant 1.67326319 : f32
    %140 = vector.broadcast %cst_113 : f32 to vector<32x128xf32>
    %141 = arith.mulf %140, %139 : vector<32x128xf32>
    %142 = arith.select %136, %134, %141 : vector<32x128xi1>, vector<32x128xf32>
    %cst_114 = arith.constant 1.05070102 : f32
    %143 = vector.broadcast %cst_114 : f32 to vector<32x128xf32>
    %144 = arith.mulf %143, %142 : vector<32x128xf32>
    %c0_115 = arith.constant 0 : index
    %c0_116 = arith.constant 0 : index
    %145 = vector.load %arg7[%c0_115, %c0_116] : memref<32x128xf32, #tpu.memory_space<vmem>>, vector<32x128xf32>
    tpu.vector_store %arg7[%c0_115, %c0_116], %144 {strides = array<i32>} : memref<32x128xf32, #tpu.memory_space<vmem>>, vector<32x128xf32>,
    return
  }
  func.func @transform_0(%arg0: i32) -> (i32, i32) {
    %c0_i32 = arith.constant 0 : i32
    %c0_i32_0 = arith.constant 0 : i32
    %c0_i32_1 = arith.constant 0 : i32
    return %c0_i32, %c0_i32_0 : i32, i32
  }
  func.func @transform_1(%arg0: i32) -> (i32, i32) {
    %c0_i32 = arith.constant 0 : i32
    %c0_i32_0 = arith.constant 0 : i32
    %c0_i32_1 = arith.constant 0 : i32
    return %c0_i32, %c0_i32_0 : i32, i32
  }
  func.func @transform_2(%arg0: i32) -> (i32, i32) {
    %c0_i32 = arith.constant 0 : i32
    %c0_i32_0 = arith.constant 0 : i32
    %c0_i32_1 = arith.constant 0 : i32
    return %c0_i32, %c0_i32_0 : i32, i32
  }
  func.func @transform_3(%arg0: i32) -> (i32, i32) {
    %c0_i32 = arith.constant 0 : i32
    %c0_i32_0 = arith.constant 0 : i32
    %c0_i32_1 = arith.constant 0 : i32
    return %c0_i32, %c0_i32_0 : i32, i32
  }
  func.func @transform_4(%arg0: i32) -> (i32, i32, i32) {
    %c0_i32 = arith.constant 0 : i32
    %c0_i32_0 = arith.constant 0 : i32
    %c0_i32_1 = arith.constant 0 : i32
    %c0_i32_2 = arith.constant 0 : i32
    return %c0_i32, %c0_i32_0, %c0_i32_1 : i32, i32, i32
  }
  func.func @transform_5(%arg0: i32) -> (i32, i32, i32) {
    %c0_i32 = arith.constant 0 : i32
    %c0_i32_0 = arith.constant 0 : i32
    %c0_i32_1 = arith.constant 0 : i32
    %c0_i32_2 = arith.constant 0 : i32
    return %c0_i32, %c0_i32_0, %c0_i32_1 : i32, i32, i32
  }
  func.func @transform_6(%arg0: i32) -> (i32, i32) {
    %c0_i32 = arith.constant 0 : i32
    %c0_i32_0 = arith.constant 0 : i32
    %c0_i32_1 = arith.constant 0 : i32
    return %c0_i32, %c0_i32_0 : i32, i32
  }
}

</mosaic_0001>

<bundles_post_ra>
// kernel: cnn_decoder_forward.1
= control target key start
LH: loop header
LB: loop body
LE: loop exit
PB: predicated region body
PF: predicated region fallthrough
CT: control target
= control target key end

     0   :  { %v1379_v2 = vmov 0   ;;  %s1731_s0 = inlined_call_operand.vmem [shape: s32[32,1], index: 0, kind: input, shape index: {}]   ;;  %s1732_s1 = inlined_call_operand.vmem [shape: f32[128,32], index: 1, kind: input, shape index: {}]   ;;  %s1733_s2 = inlined_call_operand.vmem [shape: f32[32,128], index: 2, kind: input, shape index: {}]   ;;  %s1734_s3 = inlined_call_operand.vmem [shape: f32[1,128], index: 3, kind: input, shape index: {}]   ;;  %s1735_s4 = inlined_call_operand.vmem [shape: f32[3,96,32], index: 4, kind: input, shape index: {}]   ;;  %s1736_s5 = inlined_call_operand.vmem [shape: f32[3,32,32], index: 5, kind: input, shape index: {}]   ;;  %s1737_s6 = inlined_call_operand.hbm [shape: f32[32,128], index: 6, kind: output, shape index: {}]  }
   0x1   :  { %v24_v0 = vld [vmem:[%s1731_s0] sm:$0xff]  ;;  %v26_v1 = vld [vmem:[%s1731_s0 + $0x10] sm:$0xff]  ;;  %1321 = vset.pattern.permute.xlu0 %v1379_v2  ;;  %1322 = vset.pattern.permute.xlu1 %v1379_v2  ;;  %v55_v4 = vld [vmem:[%s1732_s1 + $0x8] sm:$0xff] }
   0x2   :  { %v54_v3 = vld [vmem:[%s1732_s1] sm:$0xff]  ;;  %31 = vperm.xlu0 %1321, %v24_v0   ;;  %37 = vperm.xlu1 %1322, %v26_v1   ;;  %v25_v5 = vld [vmem:[%s1731_s0 + $0x8] sm:$0xff]  ;;  %v56_v7 = vld [vmem:[%s1732_s1 + $0x10] sm:$0xff] }
   0x3   :  { %v1201_v6 = vpack.c.bf16 %v55_v4, %v54_v3  ;;  %v57_v8 = vld [vmem:[%s1732_s1 + $0x18] sm:$0xff]  ;;  %v58_v11 = vld [vmem:[%s1732_s1 + $0x20] sm:$0xff]  ;;  %v59_v12 = vld [vmem:[%s1732_s1 + $0x28] sm:$0xff] }
   0x4   :  { %v27_v9 = vld [vmem:[%s1731_s0 + $0x18] sm:$0xff]  ;;  %v1205_v10 = vpack.c.bf16 %v57_v8, %v56_v7  ;;  %v1209_v13 = vpack.c.bf16 %v59_v12, %v58_v11 }
   0x5   :  { %1202 = vmatprep.subr.bf16.mxu0 %v1201_v6 }
   0x6   :  { %1204 = vmatpush3.bf16.msra.mxu0 %v1201_v6  ;;  %34 = vperm.xlu0 %1321, %v25_v5  }
   0x7   :  { %40 = vperm.xlu1 %1322, %v27_v9  }
   0x8   :  { %11 = vsyncpa [#allocation4], 0  ;;  %1206 = vmatprep.subr.bf16.mxu0 %v1205_v10  ;;  %v60_v14 = vld [vmem:[%s1732_s1 + $0x30] sm:$0xff]  ;;  %v61_v15 = vld [vmem:[%s1732_s1 + $0x38] sm:$0xff]  ;;  %v28_v29 = vlaneseq  ;;  %v1380_v33 = vmov 1.0   ;;  %vm155_vm4 = vcmask 261120  }
   0x9   :  { %v1213_v16 = vpack.c.bf16 %v61_v15, %v60_v14  ;;  %v62_v17 = vld [vmem:[%s1732_s1 + $0x40] sm:$0xff]  ;;  %v63_v18 = vld [vmem:[%s1732_s1 + $0x48] sm:$0xff]  ;;  %v64_v20 = vld [vmem:[%s1732_s1 + $0x50] sm:$0xff]  ;;  %v1381_v36 = vmov 0.0   ;;  %s1382_s10 = smov 64   ;;  %s1383_s11 = smov 32  }
   0xa   :  { %1208 = vmatpush3.bf16.msra.mxu0 %v1205_v10  ;;  %v1217_v19 = vpack.c.bf16 %v63_v18, %v62_v17  ;;  %v65_v21 = vld [vmem:[%s1732_s1 + $0x58] sm:$0xff]  ;;  %v66_v23 = vld [vmem:[%s1732_s1 + $0x60] sm:$0xff]  ;;  %v67_v24 = vld [vmem:[%s1732_s1 + $0x68] sm:$0xff]  ;;  %v29_v30 = vand.u32 127, %v28_v29  ;;  %156 = vst.msk [vmem:[#allocation2] sm:$0xff] %vm155_vm4, %v1381_v36  ;;  %vm211_vm5 = vcmask 523264  }
   0xb   :  { %1210 = vmatprep.subr.bf16.mxu0 %v1209_v13  ;;  %v1221_v22 = vpack.c.bf16 %v65_v21, %v64_v20  ;;  %v1225_v25 = vpack.c.bf16 %v67_v24, %v66_v23  ;;  %v68_v26 = vld [vmem:[%s1732_s1 + $0x70] sm:$0xff]  ;;  %v69_v27 = vld [vmem:[%s1732_s1 + $0x78] sm:$0xff]  ;;  %157 = vst.msk [vmem:[#allocation2 + $0x18] sm:$0xff] %vm155_vm4, %v1381_v36  ;;  %v216_v37 = vld [vmem:[%s1735_s4] sm:$0xff]  ;;  %vm232_vm6 = vcmask 785408  }
   0xc   :  { %v1229_v28 = vpack.c.bf16 %v69_v27, %v68_v26  ;;  %v217_v38 = vld [vmem:[%s1735_s4 + $0x8] sm:$0xff]  ;;  %v218_v39 = vld [vmem:[%s1735_s4 + $0x10] sm:$0xff]  ;;  %v219_v41 = vld [vmem:[%s1735_s4 + $0x18] sm:$0xff] }
   0xd   :  { %v1233_v40 = vpack.c.bf16 %v217_v38, %v216_v37  ;;  %v1237_v42 = vpack.c.bf16 %v219_v41, %v218_v39  ;;  %v220_v43 = vld [vmem:[%s1735_s4 + $0x20] sm:$0xff]  ;;  %v221_v44 = vld [vmem:[%s1735_s4 + $0x28] sm:$0xff]  ;;  %v222_v46 = vld [vmem:[%s1735_s4 + $0x30] sm:$0xff] }
   0xe   :  { %1212 = vmatpush3.bf16.msra.mxu0 %v1209_v13  ;;  %v1241_v45 = vpack.c.bf16 %v221_v44, %v220_v43  ;;  %v223_v47 = vld [vmem:[%s1735_s4 + $0x38] sm:$0xff]  ;;  %v224_v49 = vld [vmem:[%s1735_s4 + $0x40] sm:$0xff]  ;;  %v225_v50 = vld [vmem:[%s1735_s4 + $0x48] sm:$0xff] }
   0xf   :  { %1214 = vmatprep.subr.bf16.mxu0 %v1213_v16  ;;  %1234 = vmatprep.subr.bf16.mxu1 %v1233_v40  ;;  %v1245_v48 = vpack.c.bf16 %v223_v47, %v222_v46  ;;  %v1249_v51 = vpack.c.bf16 %v225_v50, %v224_v49  ;;  %v226_v52 = vld [vmem:[%s1735_s4 + $0x50] sm:$0xff]  ;;  %v227_v53 = vld [vmem:[%s1735_s4 + $0x58] sm:$0xff]  ;;  %v926_v23 = vld [vmem:[%s1735_s4 + $0x60] sm:$0xff] }
  0x10   :  { %1236 = vmatpush3.bf16.msra.mxu1 %v1233_v40  ;;  %v1253_v54 = vpack.c.bf16 %v227_v53, %v226_v52  ;;  %v927_v24 = vld [vmem:[%s1735_s4 + $0x68] sm:$0xff]  ;;  %v929_v27 = vld [vmem:[%s1735_s4 + $0x78] sm:$0xff]  ;;  %v930_v29 = vld [vmem:[%s1735_s4 + $0x80] sm:$0xff] }
  0x11   :  { %1238 = vmatprep.subr.bf16.mxu1 %v1237_v42  ;;  %v1257_v26 = vpack.c.bf16 %v927_v24, %v926_v23  ;;  %v935_v36 = vld [vmem:[%s1735_s4 + $0xa8] sm:$0xff]  ;;  %v228_v39 = vld [vmem:[%s1736_s5] sm:$0xff]  ;;  %v231_v46 = vld [vmem:[%s1736_s5 + $0x18] sm:$0xff] }
  0x12   :  { %1216 = vmatpush3.bf16.msra.mxu0 %v1213_v16  ;;  %v229_v38 = vld [vmem:[%s1736_s5 + $0x8] sm:$0xff]  ;;  %v230_v47 = vld [vmem:[%s1736_s5 + $0x10] sm:$0xff] }
  0x13   :  { %1218 = vmatprep.subr.bf16.mxu0 %v1217_v19 }
  0x14   :  { %1240 = vmatpush3.bf16.msra.mxu1 %v1237_v42 }
  0x15   :  { %1242 = vmatprep.subr.bf16.mxu1 %v1241_v45 }
  0x16   :  { %1220 = vmatpush3.bf16.msra.mxu0 %v1217_v19 }
  0x17   :  { %1222 = vmatprep.subr.bf16.mxu0 %v1221_v22 }
  0x18   :  { %1244 = vmatpush3.bf16.msra.mxu1 %v1241_v45 }
  0x19   :  { %1246 = vmatprep.subr.bf16.mxu1 %v1245_v48 }
  0x1a   :  { %1224 = vmatpush3.bf16.msra.mxu0 %v1221_v22 }
  0x1b   :  { %1226 = vmatprep.subr.bf16.mxu0 %v1225_v25 }
  0x1c   :  { %1248 = vmatpush3.bf16.msra.mxu1 %v1245_v48 }
  0x1d   :  { %1250 = vmatprep.subr.bf16.mxu1 %v1249_v51 }
  0x1e   :  { %1228 = vmatpush3.bf16.msra.mxu0 %v1225_v25  ;;  %v928_v25 = vld [vmem:[%s1735_s4 + $0x70] sm:$0xff] }
  0x1f   :  { %1230 = vmatprep.subr.bf16.mxu0 %v1229_v28 }
  0x20   :  { %1252 = vmatpush3.bf16.msra.mxu1 %v1249_v51 }
  0x21   :  { %1254 = vmatprep.subr.bf16.mxu1 %v1253_v54 }
  0x22   :  { %1232 = vmatpush3.bf16.msra.mxu0 %v1229_v28  ;;  %v1261_v28 = vpack.c.bf16 %v929_v27, %v928_v25 }
  0x24   :  { %1256 = vmatpush3.bf16.msra.mxu1 %v1253_v54 }
  0x25   :  { %1258 = vmatprep.subr.bf16.mxu1 %v1257_v26 }
  0x81   :  { %v32_v31 = vpop.permute.xlu0 %31  ;;  %v38_v32 = vpop.permute.xlu1 %37 }
  0x82   :  { %vm42_vm0 = vcmp.eq.s32.totalorder %v29_v30, %v32_v31  ;;  %vm44_vm1 = vcmp.eq.s32.totalorder %v29_v30, %v38_v32  ;;  %v932_v32 = vld [vmem:[%s1735_s4 + $0x90] sm:$0xff] }
  0x83   :  { %1091 = vmatprep.mubr.msk.f32.mxu0 %vm42_vm0, %v1380_v33 }
  0x85   :  { %v35_v34 = vpop.permute.xlu0 %34 }
  0x86   :  { %v41_v35 = vpop.permute.xlu1 %40  ;;  %vm43_vm2 = vcmp.eq.s32.totalorder %v29_v30, %v35_v34 }
  0x87   :  { %1092 = vmatmul.mubr.msk.f32.vlgmr.msra.gmra.mrb[0].mxu0 %vm43_vm2, %v1380_v33  ;;  %vm45_vm3 = vcmp.eq.s32.totalorder %v29_v30, %v41_v35  ;;  %v931_v30 = vld [vmem:[%s1735_s4 + $0x88] sm:$0xff]  ;;  %v934_v35 = vld [vmem:[%s1735_s4 + $0xa0] sm:$0xff] }
  0x88   :  { %1094 = vmatprep.mubr.msk.f32.mxu0 %vm44_vm1, %v1380_v33  ;;  %v1265_v31 = vpack.c.bf16 %v931_v30, %v930_v29  ;;  %v1273_v37 = vpack.c.bf16 %v935_v36, %v934_v35 }
  0x8b   :  { %1095 = vmatmul.mubr.msk.f32.gmra.mrb[2].mxu0 %vm45_vm3, %v1380_v33  ;;  %v933_v33 = vld [vmem:[%s1735_s4 + $0x98] sm:$0xff] }
  0x8c   :  { %v1269_v34 = vpack.c.bf16 %v933_v33, %v932_v32 }
 0x15a   :  { %v1093_v55 = vpop.f32.mrb[0].mxu0 }
 0x15b   :  { %159 = vst.msk [vmem:[#allocation2 + $0x10] sm:$0xff] %vm155_vm4, %v1093_v55  ;;  %v136_v56 = vpop.f32.mrb[1].mxu0 }
 0x15c   :  { %158 = vst.msk [vmem:[#allocation2 + $0x8] sm:$0xff] %vm155_vm4, %v136_v56 }
 0x15e   :  { %v1096_v57 = vpop.f32.mrb[2].mxu0 }
 0x15f   :  { %162 = vst.msk [vmem:[#allocation2 + $0x28] sm:$0xff] %vm155_vm4, %v1096_v57  ;;  %v146_v58 = vpop.f32.mrb[3].mxu0 }
 0x160   :  { %161 = vst.msk [vmem:[#allocation2 + $0x20] sm:$0xff] %vm155_vm4, %v146_v58 }
 0x162   :  { %v172_v59 = vld [vmem:[#allocation2 + $0x10] sm:$0xff] }
 0x163   :  { %197 = vrot.lane.b32.xlu1 %v172_v59, %s1382_s10  ;;  %v167_v60 = vld [vmem:[#allocation2 + $0x7] sm:$0xff]  ;;  %v168_v61 = vld [vmem:[#allocation2 + $0xf] sm:$0xff] }
 0x164   :  { %179 = vrot.lane.b32.xlu0 %v167_v60, %s1383_s11  ;;  %v171_v62 = vld [vmem:[#allocation2 + $0x8] sm:$0xff]  ;;  %v936_v60 = vld [vmem:[%s1735_s4 + $0xb0] sm:$0xff] }
 0x165   :  { %v163_v5 = vld [vmem:[#allocation2 + $0x6] sm:$0xff]  ;;  %v164_v7 = vld [vmem:[#allocation2 + $0xe] sm:$0xff] }
 0x166   :  { %v174_v1 = vld [vmem:[#allocation2 + $0x28] sm:$0xff] }
 0x167   :  { %181 = vrot.lane.b32.xlu1 %v168_v61, %s1383_s11  ;;  %v170_v63 = vld [vmem:[#allocation2 + $0x27] sm:$0xff]  ;;  %v169_v0 = vld [vmem:[#allocation2 + $0x1f] sm:$0xff] }
 0x168   :  { %195 = vrot.lane.b32.xlu0 %v171_v62, %s1382_s10  ;;  %v173_v2 = vld [vmem:[#allocation2 + $0x20] sm:$0xff]  ;;  %v937_v61 = vld [vmem:[%s1735_s4 + $0xb8] sm:$0xff] }
 0x169   :  { %v165_v15 = vld [vmem:[#allocation2 + $0x1e] sm:$0xff]  ;;  %v166_v17 = vld [vmem:[#allocation2 + $0x26] sm:$0xff] }
 0x16b   :  { %185 = vrot.lane.b32.xlu1 %v170_v63, %s1383_s11  ;;  %v1277_v63 = vpack.c.bf16 %v937_v61, %v936_v60 }
 0x16c   :  { %183 = vrot.lane.b32.xlu0 %v169_v0, %s1383_s11 }
 0x16f   :  { %201 = vrot.lane.b32.xlu1 %v174_v1, %s1382_s10 }
 0x170   :  { %199 = vrot.lane.b32.xlu0 %v173_v2, %s1382_s10 }
 0x1d5   :  { %v198_v3 = vpop.permute.xlu1 %197 }
 0x1d6   :  { %v180_v4 = vpop.permute.xlu0 %179 }
 0x1d7   :  { %v207_v8 = vsel %vm155_vm4, %v163_v5, %v180_v4 }
 0x1d9   :  { %v182_v6 = vpop.permute.xlu1 %181 }
 0x1da   :  { %v208_v9 = vsel %vm155_vm4, %v164_v7, %v182_v6  ;;  %v196_v10 = vpop.permute.xlu0 %195 }
 0x1db   :  { %v212_v11 = vsel %vm211_vm5, %v207_v8, %v196_v10  ;;  %v213_v12 = vsel %vm211_vm5, %v208_v9, %v198_v3 }
 0x1dc   :  { %1121 = vmatprep.mubr.msk.f32.mxu1 %vm232_vm6, %v212_v11 }
 0x1dd   :  { %1122 = vmatmul.mubr.msk.f32.vlgmr.msra.gmra.mrb[0].mxu1 %vm232_vm6, %v213_v12  ;;  %v186_v13 = vpop.permute.xlu1 %185 }
 0x1de   :  { %v184_v14 = vpop.permute.xlu0 %183  ;;  %v210_v20 = vsel %vm155_vm4, %v166_v17, %v186_v13  ;;  %1260 = vmatpush3.bf16.msra.mxu1 %v1257_v26 }
 0x1df   :  { %v209_v18 = vsel %vm155_vm4, %v165_v15, %v184_v14  ;;  %1262 = vmatprep.subr.bf16.mxu1 %v1261_v28 }
 0x1e1   :  { %v202_v16 = vpop.permute.xlu1 %201 }
 0x1e2   :  { %v200_v19 = vpop.permute.xlu0 %199  ;;  %v215_v22 = vsel %vm211_vm5, %v210_v20, %v202_v16  ;;  %1264 = vmatpush3.bf16.msra.mxu1 %v1261_v28 }
 0x1e3   :  { %v214_v21 = vsel %vm211_vm5, %v209_v18, %v200_v19  ;;  %1266 = vmatprep.subr.bf16.mxu1 %v1265_v31 }
 0x1e4   :  { %1124 = vmatprep.mubr.msk.f32.mxu1 %vm232_vm6, %v214_v21 }
 0x1e5   :  { %1125 = vmatmul.mubr.msk.f32.gmra.mrb[2].mxu1 %vm232_vm6, %v215_v22 }
 0x1e6   :  { %1268 = vmatpush3.bf16.msra.mxu1 %v1265_v31 }
 0x1e7   :  { %1270 = vmatprep.subr.bf16.mxu1 %v1269_v34 }
 0x1ea   :  { %1272 = vmatpush3.bf16.msra.mxu1 %v1269_v34 }
 0x1eb   :  { %1274 = vmatprep.subr.bf16.mxu1 %v1273_v37 }
 0x1ee   :  { %1276 = vmatpush3.bf16.msra.mxu1 %v1273_v37 }
 0x1ef   :  { %1278 = vmatprep.subr.bf16.mxu1 %v1277_v63 }
 0x1f2   :  { %1280 = vmatpush3.bf16.msra.mxu1 %v1277_v63 }
 0x2b0   :  { %v1123_v40 = vpop.f32.mrb[0].mxu1 }
 0x2b1   :  { %v317_v41 = vadd.f32 %v1123_v40, %v229_v38  ;;  %v311_v42 = vpop.f32.mrb[1].mxu1 }
 0x2b2   :  { %v312_v43 = vadd.f32 %v311_v42, %v228_v39  ;;  %v951_v42 = vld [vmem:[%s1735_s4 + $0xc8] sm:$0xff] }
 0x2b3   :  { %v336_v44 = vmul.f32 1.442695, %v317_v41  ;;  %vm331_vm7 = vcmp.gt.f32.partialorder %v317_v41, 0.0 }
 0x2b4   :  { %v334_v45 = vmul.f32 1.442695, %v312_v43  ;;  %vm330_vm8 = vcmp.gt.f32.partialorder %v312_v43, 0.0 }
 0x2b5   :  { %1323 = vpow2.f32 %v336_v44 }
 0x2b6   :  { %1325 = vpow2.f32 %v334_v45  ;;  %v953_v45 = vld [vmem:[%s1735_s4 + $0xd8] sm:$0xff] }
 0x2b8   :  { %v1126_v48 = vpop.f32.mrb[2].mxu1 }
 0x2b9   :  { %v327_v49 = vadd.f32 %v1126_v48, %v231_v46  ;;  %v321_v50 = vpop.f32.mrb[3].mxu1  ;;  %v955_v48 = vld [vmem:[%s1735_s4 + $0xe8] sm:$0xff] }
 0x2ba   :  { %v322_v51 = vadd.f32 %v321_v50, %v230_v47  ;;  %v954_v47 = vld [vmem:[%s1735_s4 + $0xe0] sm:$0xff]  ;;  %v956_v50 = vld [vmem:[%s1735_s4 + $0xf0] sm:$0xff] }
 0x2bb   :  { %v340_v52 = vmul.f32 1.442695, %v327_v49  ;;  %vm333_vm9 = vcmp.gt.f32.partialorder %v327_v49, 0.0 }
 0x2bc   :  { %v338_v53 = vmul.f32 1.442695, %v322_v51  ;;  %vm332_vm10 = vcmp.gt.f32.partialorder %v322_v51, 0.0 }
 0x2bd   :  { %1327 = vpow2.f32 %v340_v52 }
 0x2be   :  { %1329 = vpow2.f32 %v338_v53  ;;  %v958_v53 = vld [vmem:[%s1735_s4 + $0x100] sm:$0xff] }
 0x2bf   :  { %v1324_v54 = vpop.eup %1323 }
 0x2c0   :  { %v1326_v55 = vpop.eup %1325  ;;  %v923_v56 = vadd.f32 -1.0, %v1324_v54  ;;  %v959_v54 = vld [vmem:[%s1735_s4 + $0x108] sm:$0xff] }
 0x2c1   :  { %v922_v57 = vadd.f32 -1.0, %v1326_v55  ;;  %v1297_v55 = vpack.c.bf16 %v959_v54, %v958_v53 }
 0x2c2   :  { %v347_v58 = vmul.f32 1.6732632, %v923_v56  ;;  %v939_v56 = vld [vmem:[%s1736_s5 + $0x28] sm:$0xff] }
 0x2c3   :  { %v346_v59 = vmul.f32 1.6732632, %v922_v57  ;;  %v938_v57 = vld [vmem:[%s1736_s5 + $0x20] sm:$0xff] }
 0x2c4   :  { %v351_v62 = vsel %vm331_vm7, %v317_v41, %v347_v58  ;;  %v950_v41 = vld [vmem:[%s1735_s4 + $0xc0] sm:$0xff] }
 0x2c5   :  { %v355_v0 = vmul.f32 1.050701, %v351_v62  ;;  %v350_v1 = vsel %vm330_vm8, %v312_v43, %v346_v59  ;;  %v952_v43 = vld [vmem:[%s1735_s4 + $0xd0] sm:$0xff]  ;;  %v1281_v44 = vpack.c.bf16 %v951_v42, %v950_v41  ;;  %v561_v41 = vld [vmem:[#allocation2] sm:$0xff] }
 0x2c6   :  { %v354_v2 = vmul.f32 1.050701, %v350_v1  ;;  %v1285_v46 = vpack.c.bf16 %v953_v45, %v952_v43  ;;  %v940_v1 = vld [vmem:[%s1736_s5 + $0x30] sm:$0xff] }
 0x2c7   :  { %v1328_v3 = vpop.eup %1327  ;;  %359 = vst.msk [vmem:[#allocation2 + $0x10] sm:$0xff] %vm155_vm4, %v355_v0  ;;  %1282 = vmatprep.subr.bf16.mxu0 %v1281_v44  ;;  %v941_v0 = vld [vmem:[%s1736_s5 + $0x38] sm:$0xff] }
 0x2c8   :  { %v1330_v4 = vpop.eup %1329  ;;  %358 = vst.msk [vmem:[#allocation2 + $0x8] sm:$0xff] %vm155_vm4, %v354_v2  ;;  %v925_v5 = vadd.f32 -1.0, %v1328_v3  ;;  %1284 = vmatpush3.bf16.msra.mxu0 %v1281_v44 }
 0x2c9   :  { %v924_v6 = vadd.f32 -1.0, %v1330_v4  ;;  %1286 = vmatprep.subr.bf16.mxu0 %v1285_v46 }
 0x2ca   :  { %v349_v7 = vmul.f32 1.6732632, %v925_v5 }
 0x2cb   :  { %v348_v8 = vmul.f32 1.6732632, %v924_v6 }
 0x2cc   :  { %v353_v9 = vsel %vm333_vm9, %v327_v49, %v349_v7  ;;  %v1289_v49 = vpack.c.bf16 %v955_v48, %v954_v47  ;;  %1288 = vmatpush3.bf16.msra.mxu0 %v1285_v46 }
 0x2cd   :  { %v357_v10 = vmul.f32 1.050701, %v353_v9  ;;  %v352_v11 = vsel %vm332_vm10, %v322_v51, %v348_v8  ;;  %v957_v51 = vld [vmem:[%s1735_s4 + $0xf8] sm:$0xff] }
 0x2ce   :  { %v356_v12 = vmul.f32 1.050701, %v352_v11  ;;  %v371_v13 = vld [vmem:[#allocation2 + $0x10] sm:$0xff]  ;;  %1290 = vmatprep.subr.bf16.mxu0 %v1289_v49  ;;  %v1293_v52 = vpack.c.bf16 %v957_v51, %v956_v50  ;;  %v563_v50 = vld [vmem:[#allocation2 + $0x18] sm:$0xff] }
 0x2cf   :  { %361 = vst.msk [vmem:[#allocation2 + $0x28] sm:$0xff] %vm155_vm4, %v357_v10  ;;  %396 = vrot.lane.b32.xlu1 %v371_v13, %s1382_s10  ;;  %v366_v14 = vld [vmem:[#allocation2 + $0x6] sm:$0xff]  ;;  %v367_v15 = vld [vmem:[#allocation2 + $0xe] sm:$0xff] }
 0x2d0   :  { %360 = vst.msk [vmem:[#allocation2 + $0x20] sm:$0xff] %vm155_vm4, %v356_v12  ;;  %378 = vrot.lane.b32.xlu0 %v366_v14, %s1383_s11  ;;  %v370_v16 = vld [vmem:[#allocation2 + $0x8] sm:$0xff]  ;;  %1292 = vmatpush3.bf16.msra.mxu0 %v1289_v49  ;;  %v960_v14 = vld [vmem:[%s1735_s4 + $0x110] sm:$0xff] }
 0x2d1   :  { %v362_v23 = vld [vmem:[#allocation2 + $0x4] sm:$0xff]  ;;  %v363_v24 = vld [vmem:[#allocation2 + $0xc] sm:$0xff]  ;;  %1294 = vmatprep.subr.bf16.mxu0 %v1293_v52 }
 0x2d3   :  { %380 = vrot.lane.b32.xlu1 %v367_v15, %s1383_s11  ;;  %v961_v15 = vld [vmem:[%s1735_s4 + $0x118] sm:$0xff] }
 0x2d4   :  { %394 = vrot.lane.b32.xlu0 %v370_v16, %s1382_s10  ;;  %1296 = vmatpush3.bf16.msra.mxu0 %v1293_v52 }
 0x2d5   :  { %1298 = vmatprep.subr.bf16.mxu0 %v1297_v55 }
 0x2d6   :  { %v373_v19 = vld [vmem:[#allocation2 + $0x28] sm:$0xff] }
 0x2d7   :  { %v369_v17 = vld [vmem:[#allocation2 + $0x26] sm:$0xff]  ;;  %v368_v18 = vld [vmem:[#allocation2 + $0x1e] sm:$0xff] }
 0x2d8   :  { %384 = vrot.lane.b32.xlu1 %v369_v17, %s1383_s11  ;;  %382 = vrot.lane.b32.xlu0 %v368_v18, %s1383_s11  ;;  %v372_v20 = vld [vmem:[#allocation2 + $0x20] sm:$0xff]  ;;  %v1301_v17 = vpack.c.bf16 %v961_v15, %v960_v14 }
 0x2d9   :  { %v365_v33 = vld [vmem:[#allocation2 + $0x24] sm:$0xff]  ;;  %v364_v34 = vld [vmem:[#allocation2 + $0x1c] sm:$0xff]  ;;  %1300 = vmatpush3.bf16.msra.mxu0 %v1297_v55 }
 0x2da   :  { %1302 = vmatprep.subr.bf16.mxu0 %v1301_v17 }
 0x2dc   :  { %400 = vrot.lane.b32.xlu1 %v373_v19, %s1382_s10  ;;  %398 = vrot.lane.b32.xlu0 %v372_v20, %s1382_s10 }
 0x2dd   :  { %1304 = vmatpush3.bf16.msra.mxu0 %v1301_v17 }
 0x341   :  { %v397_v21 = vpop.permute.xlu1 %396 }
 0x342   :  { %v379_v22 = vpop.permute.xlu0 %378 }
 0x343   :  { %v406_v26 = vsel %vm155_vm4, %v362_v23, %v379_v22 }
 0x345   :  { %v381_v25 = vpop.permute.xlu1 %380 }
 0x346   :  { %v407_v27 = vsel %vm155_vm4, %v363_v24, %v381_v25  ;;  %v395_v28 = vpop.permute.xlu0 %394 }
 0x347   :  { %v411_v29 = vsel %vm211_vm5, %v407_v27, %v397_v21  ;;  %v410_v30 = vsel %vm211_vm5, %v406_v26, %v395_v28 }
 0x348   :  { %1151 = vmatprep.mubr.msk.f32.mxu1 %vm232_vm6, %v410_v30 }
 0x349   :  { %1152 = vmatmul.mubr.msk.f32.vlgmr.msra.gmra.mrb[4].mxu1 %vm232_vm6, %v411_v29 }
 0x34a   :  { %v385_v31 = vpop.permute.xlu1 %384  ;;  %v383_v32 = vpop.permute.xlu0 %382 }
 0x34b   :  { %v409_v35 = vsel %vm155_vm4, %v365_v33, %v385_v31  ;;  %v408_v36 = vsel %vm155_vm4, %v364_v34, %v383_v32 }
 0x34e   :  { %v401_v37 = vpop.permute.xlu1 %400  ;;  %v399_v38 = vpop.permute.xlu0 %398 }
 0x34f   :  { %v413_v39 = vsel %vm211_vm5, %v409_v35, %v401_v37  ;;  %v412_v40 = vsel %vm211_vm5, %v408_v36, %v399_v38 }
 0x350   :  { %1154 = vmatprep.mubr.msk.f32.mxu1 %vm232_vm6, %v412_v40 }
 0x351   :  { %1155 = vmatmul.mubr.msk.f32.gmra.mrb[6].mxu1 %vm232_vm6, %v413_v39 }
 0x41c   :  { %v1153_v58 = vpop.f32.mrb[4].mxu1 }
 0x41d   :  { %v516_v59 = vadd.f32 %v1153_v58, %v939_v56  ;;  %v510_v60 = vpop.f32.mrb[5].mxu1  ;;  %v755_v58 = vld [vmem:[%s1733_s2 + $0x8] sm:$0xff] }
 0x41e   :  { %v511_v61 = vadd.f32 %v938_v57, %v510_v60  ;;  %v754_v57 = vld [vmem:[%s1733_s2] sm:$0xff]  ;;  %v756_v60 = vld [vmem:[%s1733_s2 + $0x10] sm:$0xff] }
 0x41f   :  { %v535_v62 = vmul.f32 1.442695, %v516_v59  ;;  %vm530_vm11 = vcmp.gt.f32.partialorder %v516_v59, 0.0 }
 0x420   :  { %v533_v63 = vmul.f32 1.442695, %v511_v61  ;;  %vm529_vm12 = vcmp.gt.f32.partialorder %v511_v61, 0.0 }
 0x421   :  { %1331 = vpow2.f32 %v535_v62 }
 0x422   :  { %1333 = vpow2.f32 %v533_v63  ;;  %v963_v63 = vld [vmem:[%s1736_s5 + $0x48] sm:$0xff] }
 0x424   :  { %v1156_v2 = vpop.f32.mrb[6].mxu1 }
 0x425   :  { %v526_v3 = vadd.f32 %v1156_v2, %v941_v0  ;;  %v520_v4 = vpop.f32.mrb[7].mxu1  ;;  %v962_v0 = vld [vmem:[%s1736_s5 + $0x40] sm:$0xff] }
 0x426   :  { %v521_v5 = vadd.f32 %v940_v1, %v520_v4 }
 0x427   :  { %v539_v6 = vmul.f32 1.442695, %v526_v3  ;;  %vm532_vm13 = vcmp.gt.f32.partialorder %v526_v3, 0.0 }
 0x428   :  { %v537_v7 = vmul.f32 1.442695, %v521_v5  ;;  %vm531_vm14 = vcmp.gt.f32.partialorder %v521_v5, 0.0 }
 0x429   :  { %1335 = vpow2.f32 %v539_v6 }
 0x42a   :  { %1337 = vpow2.f32 %v537_v7  ;;  %v965_v7 = vld [vmem:[%s1736_s5 + $0x58] sm:$0xff] }
 0x42b   :  { %v1332_v8 = vpop.eup %1331 }
 0x42c   :  { %v1334_v9 = vpop.eup %1333  ;;  %v947_v10 = vadd.f32 -1.0, %v1332_v8  ;;  %v964_v8 = vld [vmem:[%s1736_s5 + $0x50] sm:$0xff] }
 0x42d   :  { %v946_v11 = vadd.f32 -1.0, %v1334_v9 }
 0x42e   :  { %v546_v12 = vmul.f32 1.6732632, %v947_v10 }
 0x42f   :  { %v545_v13 = vmul.f32 1.6732632, %v946_v11 }
 0x430   :  { %v550_v16 = vsel %vm530_vm11, %v516_v59, %v546_v12  ;;  %v1305_v59 = vpack.c.bf16 %v755_v58, %v754_v57 }
 0x431   :  { %v554_v18 = vmul.f32 1.050701, %v550_v16  ;;  %v549_v19 = vsel %vm529_vm12, %v511_v61, %v545_v13  ;;  %v757_v61 = vld [vmem:[%s1733_s2 + $0x18] sm:$0xff] }
 0x432   :  { %v553_v20 = vmul.f32 1.050701, %v549_v19  ;;  %1306 = vmatprep.subr.bf16.mxu1 %v1305_v59  ;;  %v1309_v62 = vpack.c.bf16 %v757_v61, %v756_v60 }
 0x433   :  { %v1336_v21 = vpop.eup %1335  ;;  %558 = vst.msk [vmem:[#allocation2 + $0x10] sm:$0xff] %vm155_vm4, %v554_v18  ;;  %1308 = vmatpush3.bf16.msra.mxu1 %v1305_v59 }
 0x434   :  { %v1338_v22 = vpop.eup %1337  ;;  %557 = vst.msk [vmem:[#allocation2 + $0x8] sm:$0xff] %vm155_vm4, %v553_v20  ;;  %v949_v23 = vadd.f32 -1.0, %v1336_v21  ;;  %1310 = vmatprep.subr.bf16.mxu1 %v1309_v62 }
 0x435   :  { %v948_v24 = vadd.f32 -1.0, %v1338_v22 }
 0x436   :  { %v548_v25 = vmul.f32 1.6732632, %v949_v23 }
 0x437   :  { %v547_v26 = vmul.f32 1.6732632, %v948_v24  ;;  %1312 = vmatpush3.bf16.msra.mxu1 %v1309_v62 }
 0x438   :  { %v552_v27 = vsel %vm532_vm13, %v526_v3, %v548_v25 }
 0x439   :  { %v556_v28 = vmul.f32 1.050701, %v552_v27  ;;  %v551_v29 = vsel %vm531_vm14, %v521_v5, %v547_v26 }
 0x43a   :  { %v555_v30 = vmul.f32 1.050701, %v551_v29  ;;  %v569_v31 = vld [vmem:[#allocation2 + $0x10] sm:$0xff] }
 0x43b   :  { %560 = vst.msk [vmem:[#allocation2 + $0x28] sm:$0xff] %vm155_vm4, %v556_v28  ;;  %593 = vrot.lane.b32.xlu1 %v569_v31, %s1382_s10  ;;  %v565_v32 = vld [vmem:[#allocation2 + $0x4] sm:$0xff]  ;;  %v566_v33 = vld [vmem:[#allocation2 + $0xc] sm:$0xff] }
 0x43c   :  { %559 = vst.msk [vmem:[#allocation2 + $0x20] sm:$0xff] %vm155_vm4, %v555_v30  ;;  %575 = vrot.lane.b32.xlu0 %v565_v32, %s1383_s11  ;;  %v562_v34 = vld [vmem:[#allocation2 + $0x8] sm:$0xff] }
 0x43f   :  { %577 = vrot.lane.b32.xlu1 %v566_v33, %s1383_s11 }
 0x440   :  { %591 = vrot.lane.b32.xlu0 %v562_v34, %s1382_s10 }
 0x442   :  { %v570_v37 = vld [vmem:[#allocation2 + $0x28] sm:$0xff] }
 0x443   :  { %v568_v35 = vld [vmem:[#allocation2 + $0x24] sm:$0xff]  ;;  %v567_v36 = vld [vmem:[#allocation2 + $0x1c] sm:$0xff] }
 0x444   :  { %581 = vrot.lane.b32.xlu1 %v568_v35, %s1383_s11  ;;  %579 = vrot.lane.b32.xlu0 %v567_v36, %s1383_s11  ;;  %v564_v38 = vld [vmem:[#allocation2 + $0x20] sm:$0xff] }
 0x445   :  { %v974_v35 = vld [vmem:[%s1734_s3] ss:$0 sm:$0xff]  ;;  %s1384_s3 = smov [#allocation3]  }
 0x446   :  { %s899_s16 = sshll.u32 %s1384_s3, 4  ;;  %s900_s16 = int_to_ptr.vmem [resolvable:$true] %s899_s16 }
 0x447   :  { %s1355_s17 = scalar_lea.vmem %s900_s16, 512  ;;  %p1360_p1 = scmp.lt.s32.totalorder %s900_s16, %s900_s16 }
 0x448   :  { %597 = vrot.lane.b32.xlu1 %v570_v37, %s1382_s10  ;;  %595 = vrot.lane.b32.xlu0 %v564_v38, %s1382_s10  ;;  %p1356_p0 = scmp.ne.s32.totalorder %s900_s16, %s1355_s17  ;;  %p1361_p2 = scmp.lt.s32.totalorder %s1355_s17, %s1355_s17 }
 0x44a   :  { %p1362_p3 = por %p1361_p2, %p1360_p1 }
 0x44c   :  { %p1363_p4 = pnand %p1362_p3, %p1356_p0 }
 0x4ad   :  { %v594_v39 = vpop.permute.xlu1 %593 }
 0x4ae   :  { %v576_v40 = vpop.permute.xlu0 %575 }
 0x4af   :  { %v603_v43 = vsel %vm155_vm4, %v561_v41, %v576_v40 }
 0x4b1   :  { %v578_v42 = vpop.permute.xlu1 %577 }
 0x4b2   :  { %v604_v44 = vsel %vm155_vm4, %v562_v34, %v578_v42  ;;  %v592_v45 = vpop.permute.xlu0 %591 }
 0x4b3   :  { %v608_v46 = vsel %vm211_vm5, %v604_v44, %v594_v39  ;;  %v607_v47 = vsel %vm211_vm5, %v603_v43, %v592_v45 }
 0x4b4   :  { %1181 = vmatprep.mubr.msk.f32.mxu0 %vm232_vm6, %v607_v47 }
 0x4b5   :  { %1182 = vmatmul.mubr.msk.f32.vlgmr.msra.gmra.mrb[4].mxu0 %vm232_vm6, %v608_v46 }
 0x4b6   :  { %v582_v48 = vpop.permute.xlu1 %581  ;;  %v580_v49 = vpop.permute.xlu0 %579 }
 0x4b7   :  { %v606_v51 = vsel %vm155_vm4, %v564_v38, %v582_v48  ;;  %v605_v52 = vsel %vm155_vm4, %v563_v50, %v580_v49 }
 0x4ba   :  { %v598_v53 = vpop.permute.xlu1 %597  ;;  %v596_v54 = vpop.permute.xlu0 %595 }
 0x4bb   :  { %v610_v55 = vsel %vm211_vm5, %v606_v51, %v598_v53  ;;  %v609_v56 = vsel %vm211_vm5, %v605_v52, %v596_v54 }
 0x4bc   :  { %1184 = vmatprep.mubr.msk.f32.mxu0 %vm232_vm6, %v609_v56 }
 0x4bd   :  { %1185 = vmatmul.mubr.msk.f32.gmra.mrb[6].mxu0 %vm232_vm6, %v610_v55 }
 0x588   :  { %v1183_v1 = vpop.f32.mrb[4].mxu0 }
 0x589   :  { %v713_v2 = vadd.f32 %v1183_v1, %v963_v63  ;;  %v707_v3 = vpop.f32.mrb[5].mxu0 }
 0x58a   :  { %v708_v4 = vadd.f32 %v962_v0, %v707_v3 }
 0x58b   :  { %v732_v5 = vmul.f32 1.442695, %v713_v2  ;;  %vm727_vm15 = vcmp.gt.f32.partialorder %v713_v2, 0.0 }
 0x58c   :  { %v730_v6 = vmul.f32 1.442695, %v708_v4  ;;  %vm726_vm0 = vcmp.gt.f32.partialorder %v708_v4, 0.0 }
 0x58d   :  { %1339 = vpow2.f32 %v732_v5 }
 0x58e   :  { %1341 = vpow2.f32 %v730_v6 }
 0x590   :  { %v1186_v9 = vpop.f32.mrb[6].mxu0 }
 0x591   :  { %v723_v10 = vadd.f32 %v1186_v9, %v965_v7  ;;  %v717_v11 = vpop.f32.mrb[7].mxu0 }
 0x592   :  { %v718_v12 = vadd.f32 %v964_v8, %v717_v11 }
 0x593   :  { %v736_v13 = vmul.f32 1.442695, %v723_v10  ;;  %vm729_vm1 = vcmp.gt.f32.partialorder %v723_v10, 0.0 }
 0x594   :  { %v734_v14 = vmul.f32 1.442695, %v718_v12  ;;  %vm728_vm2 = vcmp.gt.f32.partialorder %v718_v12, 0.0 }
 0x595   :  { %1343 = vpow2.f32 %v736_v13 }
 0x596   :  { %1345 = vpow2.f32 %v734_v14 }
 0x597   :  { %v1340_v15 = vpop.eup %1339 }
 0x598   :  { %v1342_v16 = vpop.eup %1341  ;;  %v971_v17 = vadd.f32 -1.0, %v1340_v15 }
 0x599   :  { %v970_v18 = vadd.f32 -1.0, %v1342_v16 }
 0x59a   :  { %v743_v19 = vmul.f32 1.6732632, %v971_v17 }
 0x59b   :  { %v742_v20 = vmul.f32 1.6732632, %v970_v18 }
 0x59c   :  { %v747_v21 = vsel %vm727_vm15, %v713_v2, %v743_v19 }
 0x59d   :  { %v746_v22 = vsel %vm726_vm0, %v708_v4, %v742_v20  ;;  %v751_v25 = vmul.f32 1.050701, %v747_v21 }
 0x59e   :  { %v750_v23 = vmul.f32 1.050701, %v746_v22 }
 0x59f   :  { %v1344_v24 = vpop.eup %1343 }
 0x5a0   :  { %v1346_v26 = vpop.eup %1345  ;;  %v973_v27 = vadd.f32 -1.0, %v1344_v24  ;;  %1195 = vmatprep.mubr.msk.f32.mxu1 %vm155_vm4, %v750_v23 }
 0x5a1   :  { %v972_v28 = vadd.f32 -1.0, %v1346_v26  ;;  %1196 = vmatmul.mubr.msk.f32.vlgmr.msra.gmra.mrb[8].mxu1 %vm155_vm4, %v751_v25 }
 0x5a2   :  { %v745_v29 = vmul.f32 1.6732632, %v973_v27 }
 0x5a3   :  { %v744_v30 = vmul.f32 1.6732632, %v972_v28 }
 0x5a4   :  { %v749_v31 = vsel %vm729_vm1, %v723_v10, %v745_v29 }
 0x5a5   :  { %v748_v32 = vsel %vm728_vm2, %v718_v12, %v744_v30  ;;  %v753_v34 = vmul.f32 1.050701, %v749_v31 }
 0x5a6   :  { %v752_v33 = vmul.f32 1.050701, %v748_v32 }
 0x5a8   :  { %1198 = vmatprep.mubr.msk.f32.mxu1 %vm155_vm4, %v752_v33 }
 0x5a9   :  { %1199 = vmatmul.mubr.msk.f32.gmra.mrb[10].mxu1 %vm155_vm4, %v753_v34 }
 0x674   :  { %v1197_v36 = vpop.f32.mrb[8].mxu1 }
 0x675   :  { %v849_v37 = vadd.f32 %v1197_v36, %v974_v35  ;;  %v843_v38 = vpop.f32.mrb[9].mxu1 }
 0x676   :  { %v844_v39 = vadd.f32 %v974_v35, %v843_v38 }
 0x677   :  { %v868_v40 = vmul.f32 1.442695, %v849_v37  ;;  %vm863_vm3 = vcmp.gt.f32.partialorder %v849_v37, 0.0 }
 0x678   :  { %v866_v41 = vmul.f32 1.442695, %v844_v39  ;;  %vm862_vm4 = vcmp.gt.f32.partialorder %v844_v39, 0.0 }
 0x679   :  { %1347 = vpow2.f32 %v868_v40 }
 0x67a   :  { %1349 = vpow2.f32 %v866_v41 }
 0x67c   :  { %v1200_v42 = vpop.f32.mrb[10].mxu1 }
 0x67d   :  { %v859_v43 = vadd.f32 %v1200_v42, %v974_v35  ;;  %v853_v44 = vpop.f32.mrb[11].mxu1 }
 0x67e   :  { %v854_v45 = vadd.f32 %v974_v35, %v853_v44 }
 0x67f   :  { %v872_v46 = vmul.f32 1.442695, %v859_v43  ;;  %vm865_vm5 = vcmp.gt.f32.partialorder %v859_v43, 0.0 }
 0x680   :  { %v870_v47 = vmul.f32 1.442695, %v854_v45  ;;  %vm864_vm6 = vcmp.gt.f32.partialorder %v854_v45, 0.0 }
 0x681   :  { %1351 = vpow2.f32 %v872_v46 }
 0x682   :  { %1353 = vpow2.f32 %v870_v47 }
 0x683   :  { %v1348_v48 = vpop.eup %1347 }
 0x684   :  { %v1350_v49 = vpop.eup %1349  ;;  %v980_v50 = vadd.f32 -1.0, %v1348_v48 }
 0x685   :  { %v979_v51 = vadd.f32 -1.0, %v1350_v49 }
 0x686   :  { %v879_v52 = vmul.f32 1.6732632, %v980_v50 }
 0x687   :  { %v878_v53 = vmul.f32 1.6732632, %v979_v51 }
 0x688   :  { %v883_v54 = vsel %vm863_vm3, %v849_v37, %v879_v52 }
 0x689   :  { %v887_v55 = vmul.f32 1.050701, %v883_v54  ;;  %v882_v56 = vsel %vm862_vm4, %v844_v39, %v878_v53 }
 0x68a   :  { %v886_v57 = vmul.f32 1.050701, %v882_v56 }
 0x68b   :  { %v1352_v58 = vpop.eup %1351  ;;  %891 = vst [vmem:[#allocation3 + $0x8] sm:$0xff] %v887_v55 }
 0x68c   :  { %v1354_v59 = vpop.eup %1353  ;;  %890 = vst [vmem:[#allocation3] sm:$0xff] %v886_v57  ;;  %v982_v60 = vadd.f32 -1.0, %v1352_v58 }
 0x68d   :  { %v981_v61 = vadd.f32 -1.0, %v1354_v59 }
 0x68e   :  { %v881_v62 = vmul.f32 1.6732632, %v982_v60 }
 0x68f   :  { %v880_v63 = vmul.f32 1.6732632, %v981_v61 }
 0x690   :  { %v885_v0 = vsel %vm865_vm5, %v859_v43, %v881_v62 }
 0x691   :  { %v889_v1 = vmul.f32 1.050701, %v885_v0  ;;  %v884_v2 = vsel %vm864_vm6, %v854_v45, %v880_v63 }
 0x692   :  { %v888_v3 = vmul.f32 1.050701, %v884_v2 }
 0x693   :  { %893 = vst [vmem:[#allocation3 + $0x18] sm:$0xff] %v889_v1 }
 0x694   :  { %892 = vst [vmem:[#allocation3 + $0x10] sm:$0xff] %v888_v3 }
 0x695   :  { %1366 = shalt.err (!%p1363_p4)
}
 0x696   :  { %s1367_s19 = scalar_lea.hbm %s1737_s6, 512 }
 0x697   :  { %p1368_p5 = scmp.ne.s32.totalorder %s1737_s6, %s1367_s19  ;;  %p1371_p6 = scmp.lt.u32.totalorder %s1367_s19, %s1737_s6 }
 0x699   :  { %p1373_p7 = pnand %p1371_p6, %p1368_p5 }
 0x69b   :  { %1376 = shalt.err (!%p1373_p7)
}
 0x69c   :  { %s1385_s24 = smov 128   ;;  %s1386_s25 = smov 8  }
 0x69d   :  { %905 = dma.vmem_to_hbm [thread:$0]  %s900_s16, 512, %s1737_s6, [#allocation4], %s1385_s24, %s1385_s24, %s1386_s25  }
 0x69e   :  { %1377 = dma.done.wait [#allocation4], 512  }
 0x69f   :  { %1378 = vsyncadd [#allocation4], 4294966784 }
 0x6a0   :  { %909 = vsyncpa [#allocation4], 1 }

</bundles_post_ra>
